<compile_context>
chip_gen: v7x
topology: tpu7x:2x2x1
jax: 0.10.0
libtpu: 0.0.40
codegen_flags: <defaults>
</compile_context>

<pallas_src>
import functools

import jax
import jax.numpy as jnp
from jax.experimental import pallas as pl
from jax.experimental.pallas import tpu as pltpu


def _round_up(x: int, m: int) -> int:
    return ((x + m - 1) // m) * m


def _pick_tile_n(n: int, c: int, itemsize: int) -> int:
    """Largest sublane-aligned row tile that fits a conservative VMEM budget."""
    budget = 10 * 1024 * 1024                 # safe on v5e (16 MiB scoped) .. v7x (64 MiB)
    per_row = c * (2 * itemsize + 5 * 4)      # double-buffered input + ~5 live f32 temps
    t = max(8, budget // per_row)
    t = min(int(t), 1024)
    t = max(8, (t // 8) * 8)                  # keep sublane (8) alignment
    return min(t, _round_up(n, 8))            # never larger than (padded) N


def _ls_ce_kernel(logits_ref, targets_ref, partial_ref, *,
                  smoothing: float, n_total: int, tile_n: int):
    # logits_ref:  (TILE_N, C) input dtype (VMEM, auto-pipelined)
    # targets_ref: (TILE_N, 1) int32 (VMEM)
    # partial_ref: (1, 1, 128) f32 per-tile partial-sum output (lane-dense)
    i = pl.program_id(0)

    x = logits_ref[...].astype(jnp.float32)                    # upcast in-kernel only
    tn, c = x.shape
    t = targets_ref[...]                                       # (TILE_N, 1) int32

    # Numerically-stable pieces of log_softmax; log_probs is never materialized.
    m = jnp.max(x, axis=-1, keepdims=True)                     # (TILE_N, 1)
    shifted = x - m                                            # (TILE_N, C)
    lse = jnp.log(jnp.sum(jnp.exp(shifted), axis=-1, keepdims=True))   # (TILE_N, 1)

    # shifted[row, target[row]] via iota-compare + select + row reduce (VPU/XLU; no scatter).
    cls_ids = jax.lax.broadcasted_iota(jnp.int32, (tn, c), 1)
    picked = jnp.sum(jnp.where(cls_ids == t, shifted, 0.0), axis=-1, keepdims=True)
    sum_shifted = jnp.sum(shifted, axis=-1, keepdims=True)

    # per-row loss = -(1-s)*lp[target] - (s/C)*sum_c lp, with lp = shifted - lse
    per_row = (-(1.0 - smoothing) * (picked - lse)
               - (smoothing / float(c)) * (sum_shifted - float(c) * lse))

    # Mask padded rows of the last (ragged) tile so they contribute exactly 0.
    row_ids = i * tile_n + jax.lax.broadcasted_iota(jnp.int32, (tn, 1), 0)
    per_row = jnp.where(row_ids < n_total, per_row, 0.0)

    tile_sum = jnp.sum(per_row)                                # scalar f32
    partial_ref[...] = jnp.broadcast_to(tile_sum, (1, 1, 128)).astype(jnp.float32)


def label_smoothing_cross_entropy(logits, targets, smoothing: float = 0.1,
                                  tile_n: int | None = None):
    """logits: (N, C) float (f32/bf16), targets: (N,) int -> scalar f32 loss."""
    N, C = logits.shape
    itemsize = jnp.dtype(logits.dtype).itemsize
    targets_2d = targets.astype(jnp.int32).reshape(N, 1)

    if tile_n is None:
        tile_n = _pick_tile_n(N, C, itemsize)
    tile_n = max(8, _round_up(int(tile_n), 8))                 # sublane alignment
    num_tiles = pl.cdiv(N, tile_n)

    kernel = functools.partial(_ls_ce_kernel, smoothing=float(smoothing),
                               n_total=N, tile_n=tile_n)

    cost = pl.CostEstimate(
        flops=7 * N * C,
        transcendentals=N * C + N,                       # exp per element + log per row
        bytes_accessed=N * C * itemsize + N * 4 + num_tiles * 128 * 4,
    )

    partials = pl.pallas_call(
        kernel,
        out_shape=jax.ShapeDtypeStruct((num_tiles, 1, 128), jnp.float32),
        grid=(num_tiles,),
        in_specs=[
            pl.BlockSpec((tile_n, C), lambda i: (i, 0)),       # streamed logits rows
            pl.BlockSpec((tile_n, 1), lambda i: (i, 0)),       # matching targets column
        ],
        out_specs=pl.BlockSpec((1, 1, 128), lambda i: (i, 0, 0)),  # per-tile partial sum
        compiler_params=pltpu.CompilerParams(
            dimension_semantics=("parallel",),            # independent tiles -> megacore OK
            vmem_limit_bytes=40 * 1024 * 1024,
        ),
        cost_estimate=cost,
    )(logits, targets_2d)

    # Tiny final reduction (num_tiles scalars) done in the wrapper.
    return jnp.sum(partials[:, 0, 0]) / jnp.float32(N)


def _reference(logits, targets, smoothing: float = 0.1):
    # Pure-JAX reference mirroring the PyTorch forward.
    log_probs = jax.nn.log_softmax(logits.astype(jnp.float32), axis=-1)
    onehot = jax.nn.one_hot(targets, logits.shape[1], dtype=jnp.float32)
    smoothed = (1.0 - smoothing) * onehot + smoothing / logits.shape[1]
    return (-smoothed * log_probs).mean(0).sum()


if __name__ == "__main__":
    key = jax.random.PRNGKey(0)
    k1, k2 = jax.random.split(key)

    N, C = 20, 32                      # small batch of logits over 32 classes
    logits = jax.random.normal(k1, (N, C), dtype=jnp.float32) * 2.0
    targets = jax.random.randint(k2, (N,), 0, C, dtype=jnp.int32)

    ref = _reference(logits, targets, smoothing=0.1)

    # Forced small tile: 3 grid steps, last one ragged (exercises per-tile partials + mask).
    loss_tiled = label_smoothing_cross_entropy(logits, targets, smoothing=0.1, tile_n=8)
    jax.block_until_ready(loss_tiled)
    assert jnp.allclose(loss_tiled, ref, rtol=1e-5, atol=1e-5), (loss_tiled, ref)

    # Auto tile size (single padded tile here).
    loss_auto = label_smoothing_cross_entropy(logits, targets, smoothing=0.1)
    jax.block_until_ready(loss_auto)
    assert jnp.allclose(loss_auto, ref, rtol=1e-5, atol=1e-5), (loss_auto, ref)

    # bf16 logits stay bf16 in HBM and are upcast in-kernel only.
    logits_bf16 = logits.astype(jnp.bfloat16)
    ref_bf16 = _reference(logits_bf16, targets, smoothing=0.1)
    loss_bf16 = label_smoothing_cross_entropy(logits_bf16, targets, smoothing=0.1)
    jax.block_until_ready(loss_bf16)
    assert jnp.allclose(loss_bf16, ref_bf16, rtol=1e-4, atol=1e-4), (loss_bf16, ref_bf16)

    print("KERNEL_OK")
</pallas_src>

<mosaic_0001>
module attributes {stable_mosaic.version = 11 : i64} {
  func.func @_ls_ce_kernel(%arg0: i32, %arg1: memref<8x32xf32, #tpu.memory_space<vmem>>, %arg2: memref<8x1xi32, #tpu.memory_space<vmem>>, %arg3: memref<1x1x128xf32, #tpu.memory_space<vmem>>) attributes {dimension_semantics = [#tpu.dimension_semantics<parallel>], iteration_bounds = array<i64: 3>, scalar_prefetch = 0 : i64, scratch_operands = 0 : i64, tpu.core_type = #tpu.core_type<tc>, window_params = [{transform_indices = @transform_0, window_bounds = array<i64: 8, 32>}, {transform_indices = @transform_1, window_bounds = array<i64: 8, 1>}, {transform_indices = @transform_2, window_bounds = array<i64: 1, 1, 128>}]} {
    %c0 = arith.constant 0 : index
    %c0_0 = arith.constant 0 : index
    %0 = vector.load %arg1[%c0, %c0_0] : memref<8x32xf32, #tpu.memory_space<vmem>>, vector<8x32xf32>
    %c0_1 = arith.constant 0 : index
    %c0_2 = arith.constant 0 : index
    %1 = vector.load %arg2[%c0_1, %c0_2] : memref<8x1xi32, #tpu.memory_space<vmem>>, vector<8x1xi32>
    %cst = arith.constant dense<0xFF800000> : vector<8xf32>
    %2 = vector.multi_reduction <maximumf>, %0, %cst [1] : vector<8x32xf32> to vector<8xf32>
    %3 = vector.shape_cast %2 : vector<8xf32> to vector<8x1xf32>
    %4 = vector.broadcast %3 : vector<8x1xf32> to vector<8x32xf32>
    %5 = arith.subf %0, %4 : vector<8x32xf32>
    %6 = math.exp %5 : vector<8x32xf32>
    %cst_3 = arith.constant dense<0.000000e+00> : vector<8xf32>
    %7 = vector.multi_reduction <add>, %6, %cst_3 [1] : vector<8x32xf32> to vector<8xf32>
    %8 = vector.shape_cast %7 : vector<8xf32> to vector<8x1xf32>
    %9 = math.log %8 : vector<8x1xf32>
    %10 = tpu.iota {dimensions = array<i32: 1>} : vector<8x32xi32>
    %11 = vector.broadcast %1 : vector<8x1xi32> to vector<8x32xi32>
    %12 = arith.cmpi eq, %10, %11 : vector<8x32xi32>
    %cst_4 = arith.constant 0.000000e+00 : f32
    %13 = vector.broadcast %cst_4 : f32 to vector<8x32xf32>
    %14 = arith.select %12, %5, %13 : vector<8x32xi1>, vector<8x32xf32>
    %cst_5 = arith.constant dense<0.000000e+00> : vector<8xf32>
    %15 = vector.multi_reduction <add>, %14, %cst_5 [1] : vector<8x32xf32> to vector<8xf32>
    %16 = vector.shape_cast %15 : vector<8xf32> to vector<8x1xf32>
    %cst_6 = arith.constant dense<0.000000e+00> : vector<8xf32>
    %17 = vector.multi_reduction <add>, %5, %cst_6 [1] : vector<8x32xf32> to vector<8xf32>
    %18 = vector.shape_cast %17 : vector<8xf32> to vector<8x1xf32>
    %19 = arith.subf %16, %9 : vector<8x1xf32>
    %cst_7 = arith.constant -0.899999976 : f32
    %20 = vector.broadcast %cst_7 : f32 to vector<8x1xf32>
    %21 = arith.mulf %20, %19 : vector<8x1xf32>
    %cst_8 = arith.constant 3.200000e+01 : f32
    %22 = vector.broadcast %cst_8 : f32 to vector<8x1xf32>
    %23 = arith.mulf %22, %9 : vector<8x1xf32>
    %24 = arith.subf %18, %23 : vector<8x1xf32>
    %cst_9 = arith.constant 3.125000e-03 : f32
    %25 = vector.broadcast %cst_9 : f32 to vector<8x1xf32>
    %26 = arith.mulf %25, %24 : vector<8x1xf32>
    %27 = arith.subf %21, %26 : vector<8x1xf32>
    %c8_i32 = arith.constant 8 : i32
    %28 = arith.muli %arg0, %c8_i32 : i32
    %29 = tpu.iota {dimensions = array<i32: 0>} : vector<8x1xi32>
    %30 = vector.broadcast %28 : i32 to vector<8x1xi32>
    %31 = arith.addi %30, %29 : vector<8x1xi32>
    %c20_i32 = arith.constant 20 : i32
    %32 = vector.broadcast %c20_i32 : i32 to vector<8x1xi32>
    %33 = arith.cmpi slt, %31, %32 : vector<8x1xi32>
    %cst_10 = arith.constant 0.000000e+00 : f32
    %34 = vector.broadcast %cst_10 : f32 to vector<8x1xf32>
    %35 = arith.select %33, %27, %34 : vector<8x1xi1>, vector<8x1xf32>
    %36 = vector.shape_cast %35 : vector<8x1xf32> to vector<1x8x1xf32>
    %cst_11 = arith.constant dense<0.000000e+00> : vector<1xf32>
    %37 = vector.multi_reduction <add>, %36, %cst_11 [1, 2] : vector<1x8x1xf32> to vector<1xf32>
    %38 = vector.shape_cast %37 : vector<1xf32> to vector<1x1x1xf32>
    %39 = vector.extract %38[0, 0, 0] : f32 from vector<1x1x1xf32>
    %40 = vector.broadcast %39 : f32 to vector<1x1x128xf32>
    %c0_12 = arith.constant 0 : index
    %c0_13 = arith.constant 0 : index
    %c0_14 = arith.constant 0 : index
    %41 = vector.load %arg3[%c0_12, %c0_13, %c0_14] : memref<1x1x128xf32, #tpu.memory_space<vmem>>, vector<1x1x128xf32>
    tpu.vector_store %arg3[%c0_12, %c0_13, %c0_14], %40 {strides = array<i32>} : memref<1x1x128xf32, #tpu.memory_space<vmem>>, vector<1x1x128xf32>,
    return
  }
  func.func @transform_0(%arg0: i32) -> (i32, i32) {
    %c0_i32 = arith.constant 0 : i32
    %c0_i32_0 = arith.constant 0 : i32
    return %arg0, %c0_i32 : i32, i32
  }
  func.func @transform_1(%arg0: i32) -> (i32, i32) {
    %c0_i32 = arith.constant 0 : i32
    %c0_i32_0 = arith.constant 0 : i32
    return %arg0, %c0_i32 : i32, i32
  }
  func.func @transform_2(%arg0: i32) -> (i32, i32, i32) {
    %c0_i32 = arith.constant 0 : i32
    %c0_i32_0 = arith.constant 0 : i32
    %c0_i32_1 = arith.constant 0 : i32
    return %arg0, %c0_i32, %c0_i32_0 : i32, i32, i32
  }
}

</mosaic_0001>

<bundles_post_ra>
// kernel: tpu_custom_call.1
= control target key start
LH: loop header
LB: loop body
LE: loop exit
PB: predicated region body
PF: predicated region fallthrough
CT: control target
= control target key end

     0   :  { %7 = vsyncpa [#allocation3], 0  ;;  %s534_s0 = inlined_call_operand.vmem [shape: f32[20,32], index: 0, kind: input, shape index: {}]   ;;  %s535_s1 = inlined_call_operand.vmem [shape: s32[20,1], index: 1, kind: input, shape index: {}]   ;;  %s536_s2 = inlined_call_operand.hbm [shape: f32[3,1,128], index: 2, kind: output, shape index: {}]  }
   0x1   :  { %9 = vsyncpa [#allocation3 + $0x1], 0  ;;  %s426_s9 = smov 0   ;;  %s428_s10 = smov 0  }
   0x2   :  { %s430_s11 = smov 0   ;;  %s432_s12 = smov 0  }
   0x3 LB: > { %s447_s13 = sadd.s32 4294967295, %s407_s12   ;;  %s288_s14 = sadd.s32 4294967294, %s407_s12   ;;  %s407_s12 = sphi %s432_s12, %s542_s12   ;;  %s403_s11 = sphi %s430_s11, %s541_s11   ;;  %s399_s10 = sphi %s428_s10, %s540_s10   ;;  %s395_s9 = sphi %s426_s9, %s539_s9  }
   0x4   : > { %s451_s15 = sadd.s32 1, %s407_s12   ;;  %s74_s16 = sadd.s32 1, %s403_s11 }
   0x5   : > { %s71_s17 = ssub.s32 %s407_s12, %s451_s15  ;;  %p84_p0 = scmp.ne.s32.totalorder %s403_s11, %s399_s10 }
   0x6   : > { %p72_p1 = scmp.eq.s32.totalorder %s71_s17, 0  ;;  %p85_p2 = scmp.eq.s32.totalorder %s447_s13, 2 }
   0x7   : > { %p90_p3 = scmp.ne.s32.totalorder %s399_s10, %s395_s9  ;;  %p91_p4 = scmp.eq.s32.totalorder %s288_s14, 2 }
   0x8   : > { %s462_s18 = scalar_select %p72_p1, %s403_s11, %s74_s16  }
   0x9   : > { %p464_p5 = por %p85_p2, %p84_p0  ;;  %p468_p6 = por %p91_p4, %p90_p3 }
   0xa   : > { %p291_p7 = scmp.ge.s32.totalorder %s407_s12, 1  ;;  %p123_p8 = scmp.lt.s32.totalorder %s407_s12, 4 }
   0xc   : > { %p124_p9 = pnand %p291_p7, %p123_p8 }
   0xd   : > { %p147_p10 = scmp.lt.s32.totalorder (!%p124_p9), %s447_s13, 2  ;;  %v409_v0 = vmov (!%p124_p9), 0   ;;  %vm157_vm0 = vcmask (!%p124_p9), 261120   ;;  %v169_v7 = vlaneseq (!%p124_p9)  ;;  %s294_s29 = sshll.u32 (!%p124_p9), %s447_s13, 3  ;;  %vm195_vm3 = vcmask (!%p124_p9), 7168  }
   0xe   : > { %127 = sbr.rel (%p124_p9) target bundleno = 569 (0x239), region = 28  ;;  %340 = vset.pattern.permute.xlu0 (!%p124_p9), %v409_v0  ;;  %v191_v20 = vstv (!%p124_p9), %s294_s29  ;;  %s145_s30 = sand.u32 (!%p124_p9), 1, %s399_s10  }
   0xf   : > { %v170_v8 = vand.u32 (!%p124_p9), 127, %v169_v7  ;;  %v190_v18 = vshrl.u32 (!%p124_p9), %v169_v7, 7  ;;  %s146_s3 = scalar_lea.vmem (!%p124_p9), [#allocation2], %s145_s30  ;;  %s295_s5 = sshll.u32 (!%p124_p9), %s447_s13, 4 }
  0x10   : > { %s221_s4 = sshll.u32 (!%p124_p9), %s146_s3, 4  ;;  %s494_s14 = scalar_lea.hbm (!%p124_p9), %s536_s2, %s295_s5  ;;  %s489_s4 = int_to_ptr.vmem [resolvable:$true] %s221_s4 }
  0x11   : > { %v192_v24 = vadd.s32 (!%p124_p9), %v191_v20, %v190_v18  ;;  %s209_s16 = scalar_lea.sflag (!%p124_p9), [#allocation3], %s145_s30  ;;  %s345_s17 = scalar_lea.vmem (!%p124_p9), %s489_s4, 16 }
  0x12   : > { %p346_p11 = scmp.ne.s32.totalorder (!%p124_p9), %s489_s4, %s345_s17 }
  0x13   : > { %vm193_vm2 = vcmp.lt.s32.totalorder (!%p124_p9), %v192_v24, 20 }
  0x14   : > { %p347_p12 = pnand (!%p124_p9), %p346_p11, %p464_p5 }
  0x15   : > { %s148_s21 = scalar_select %p147_p10, %s447_s13, 2 }
  0x16   : > { %p348_p13 = pneg %p347_p12  ;;  %s410_s13 = smov [#allocation2]  }
  0x17   : > { %s292_s22 = sshll.u32 %s148_s21, 3  ;;  %s349_s21 = sshll.u32 %s410_s13, 4  ;;  %s350_s21 = int_to_ptr.vmem [resolvable:$false] %s349_s21 }
  0x18   : > { %s150_s25 = scalar_lea.vmem %s534_s0, %s292_s22  ;;  %s154_s28 = scalar_lea.vmem %s535_s1, %s292_s22 }
  0x19   : > { %v155_v1 = vld [vmem:[%s150_s25] sm:$0xff]  ;;  %s351_s22 = scalar_lea.vmem %s350_s21, 32  ;;  %p352_p0 = scmp.lt.s32.totalorder %s489_s4, %s350_s21 }
  0x1a   : > { %v158_v2 = vsel %vm157_vm0, %v155_v1, -inf  ;;  %v156_v3 = vld [vmem:[%s154_s28] sm:$0xff]  ;;  %p353_p1 = scmp.lt.s32.totalorder %s351_s22, %s345_s17 }
  0x1b   : > { %159 = vmax.xlane.f32.xlu0 %v158_v2 }
  0x1c   : > { %p354_p2 = por %p353_p1, %p352_p0 }
  0x1e   : > { %p355_p3 = pnand %p354_p2, %p348_p13 }
  0x31   : > { %172 = vperm.xlu0 %340, %v156_v3  }
  0xa8   : > { %v160_v4 = vpop.xlane.xlu0 %159 }
  0xa9   : > { %v161_v5 = vsub.f32 %v155_v1, %v160_v4 }
  0xab   : > { %v162_v6 = vmul.f32 1.442695, %v161_v5  ;;  %v179_v14 = vsel %vm157_vm0, %v161_v5, 0.0 }
  0xad   : > { %341 = vpow2.f32 %v162_v6 }
  0xb0   : > { %v173_v9 = vpop.permute.xlu0 %172 }
  0xb1   : > { %vm174_vm1 = vcmp.eq.s32.totalorder %v170_v8, %v173_v9 }
  0xb2   : > { %v175_v12 = vsel %vm174_vm1, %v161_v5, 0.0 }
  0xb3   : > { %v176_v13 = vsel %vm157_vm0, %v175_v12, 0.0 }
  0xb7   : > { %v342_v10 = vpop.eup %341 }
  0xb8   : > { %v164_v11 = vsel %vm157_vm0, %v342_v10, 0.0 }
  0xb9   : > { %165 = vadd.xlane.f32.xlu1 %v164_v11 }
  0xbd   : > { %177 = vadd.xlane.f32.xlu1 %v176_v13 }
  0xc1   : > { %180 = vadd.xlane.f32.xlu1 %v179_v14 }
 0x146   : > { %v166_v15 = vpop.xlane.xlu1 %165 }
 0x147   : > { %343 = vlog2.f32 %v166_v15 }
 0x14a   : > { %v178_v16 = vpop.xlane.xlu1 %177 }
 0x14e   : > { %v181_v23 = vpop.xlane.xlu1 %180 }
 0x151   : > { %v344_v17 = vpop.eup %343 }
 0x152   : > { %v168_v19 = vmul.f32 0.6931472, %v344_v17 }
 0x154   : > { %v182_v21 = vsub.f32 %v178_v16, %v168_v19  ;;  %v184_v22 = vmul.f32 32.0, %v168_v19 }
 0x156   : > { %v185_v25 = vsub.f32 %v181_v23, %v184_v22  ;;  %v183_v26 = vmul.f32 -0.9, %v182_v21 }
 0x158   : > { %v186_v27 = vmul.f32 0.003125, %v185_v25 }
 0x15a   : > { %v187_v28 = vsub.f32 %v183_v26, %v186_v27 }
 0x15c   : > { %v194_v29 = vsel %vm193_vm2, %v187_v28, 0.0 }
 0x15d   : > { %v196_v30 = vsel %vm195_vm3, %v194_v29, 0.0 }
 0x15e   : > { %197 = vadd.xlane.f32.xlu1 %v196_v30 }
 0x1eb   : > { %v198_v31 = vpop.xlane.xlu1 %197 }
 0x1ec   : > { %v199_v32 = vrot.slane %v198_v31, 4 }
 0x1ee   : > { %v200_v33 = vadd.f32 %v199_v32, %v198_v31 }
 0x1f0   : > { %v201_v34 = vrot.slane %v200_v33, 2 }
 0x1f2   : > { %v202_v35 = vadd.f32 %v201_v34, %v200_v33 }
 0x1f4   : > { %v203_v36 = vrot.slane %v202_v35, 1 }
 0x1f6   : > { %v204_v37 = vadd.f32 %v203_v36, %v202_v35 }
 0x1f8   : > { %298 = vpush %v204_v37 }
 0x229   : > { %s299_s6 = spop %298 }
 0x22a   : > { %v206_v38 = vstv %s299_s6 }
 0x22b   : > { %207 = vst [vmem:[%s146_s3] sm:$0x1] %v206_v38 }
 0x22c   : > { %358 = shalt.err (!%p355_p3)
}
 0x22d   : > { %s359_s23 = scalar_lea.hbm %s494_s14, 16  ;;  %s363_s26 = scalar_lea.hbm %s536_s2, 48 }
 0x22e   : > { %p360_p4 = scmp.ne.s32.totalorder %s494_s14, %s359_s23  ;;  %p364_p9 = scmp.lt.u32.totalorder %s494_s14, %s536_s2 }
 0x22f   : > { %p365_p10 = scmp.lt.u32.totalorder %s363_s26, %s359_s23  ;;  %p367_p12 = scmp.lt.u32.totalorder %s359_s23, %s494_s14 }
 0x230   : > { %p361_p7 = pnand %p360_p4, %p464_p5 }
 0x231   : > { %p366_p11 = por %p365_p10, %p364_p9 }
 0x232   : > { %p362_p8 = pneg %p361_p7 }
 0x233   : > { %p368_p13 = por %p367_p12, %p366_p11 }
 0x235   : > { %p369_p0 = pnand %p368_p13, %p362_p8 }
 0x237   : > { %372 = shalt.err (!%p369_p0)
}
 0x238   : > { %300 = dma.vmem_to_hbm [thread:$0]  (%p464_p5), %s489_s4, 16, %s494_s14, %s209_s16  }
 0x239 PF: > { %p306_p1 = scmp.ge.s32.totalorder %s407_s12, 2  ;;  %s233_s29 = sand.u32 1, %s395_s9  }
 0x23a   : > { %s234_s30 = scalar_lea.sflag [#allocation3], %s233_s29 }
 0x23b   : > { %p303_p2 = pnand %p306_p1, %p468_p6 }
 0x23d   : > { %390 = dma.done.wait (!%p303_p2), %s234_s30, 16  }
 0x23e   : > { %392 = vsyncadd (!%p303_p2), %s234_s30, 4294967280  ;;  %p12_p3 = scmp.ge.s32.totalorder %s451_s15, 5   ;;  %s539_s9 = smov %s399_s10 }
 0x23f   : > { %s540_s10 = smov %s403_s11  ;;  %s541_s11 = smov %s462_s18 }
 0x240   : > { %s542_s12 = smov %s451_s15  ;;  %14 = sbr.rel (!%p12_p3) target bundleno = 3 (0x3), region = 66 }
 0x247   :  { %238 = vsyncpa [#allocation3], 1 }
 0x248   :  { %240 = vsyncpa [#allocation3 + $0x1], 1 }

</bundles_post_ra>
